<compile_context>
chip_gen: v7x
topology: tpu7x:2x2x1
jax: 0.10.0
libtpu: 0.0.40
codegen_flags: <defaults>
</compile_context>

<pallas_src>
import jax
import jax.numpy as jnp
from jax.experimental import pallas as pl
from jax.experimental.pallas import tpu as pltpu


H1 = 256   # fc1 width
H2 = 128   # fc2 width


def _critic_kernel(x_ref, w1_ref, w2_ref, const_ref, q_ref):
    # Matmul compute dtype follows the stored weights (bf16 default, f32 opt);
    # accumulation is always f32 via preferred_element_type.
    cd = w1_ref.dtype

    # Static, lane-aligned slices of the packed constant slab (1, 513):
    #   [0:256) b1 | [256:384) b2 | [384:512) w3 row | [512:513) b3
    b1 = const_ref[:, 0:H1]
    b2 = const_ref[:, H1:H1 + H2]
    w3 = const_ref[:, H1 + H2:H1 + 2 * H2]
    b3 = const_ref[:, H1 + 2 * H2:H1 + 2 * H2 + 1]

    x = x_ref[...].astype(cd)   # 1/max_action already folded into W1's action rows

    # fc1 (single K=obs+act MXU pass) + relu
    h1 = jnp.dot(x, w1_ref[...], preferred_element_type=jnp.float32) + b1
    h1 = jnp.maximum(h1, 0.0)

    # fc2 + relu
    h2 = jnp.dot(h1.astype(cd), w2_ref[...],
                 preferred_element_type=jnp.float32) + b2
    h2 = jnp.maximum(h2, 0.0)

    # q_out (128 -> 1): VPU multiply + cross-lane reduce (no N=1 MXU pass)
    q_ref[...] = jnp.sum(h2 * w3, axis=-1, keepdims=True) + b3


def prepare_critic_params(raw, max_action, compute_dtype=jnp.bfloat16):
    """One-time host-side parameter transform:
       - fold 1/max_action into the action rows of W1,
       - store the two matmul weights in the compute dtype (bf16 default),
       - pack b1 / b2 / w3-row / b3 into a single (1, 513) f32 constant slab."""
    obs = raw["obs_shape"]
    w1 = raw["w1"]                                   # (obs+act, 256), stored [in, out]
    w1 = jnp.concatenate([w1[:obs, :], w1[obs:, :] / max_action], axis=0)
    const = jnp.concatenate(
        [raw["b1"].reshape(1, -1),                   # (1, 256)
         raw["b2"].reshape(1, -1),                   # (1, 128)
         raw["w3"].reshape(1, -1),                   # (1, 128)
         raw["b3"].reshape(1, -1)], axis=1)          # (1, 1)   -> (1, 513)
    return {
        "w1":    w1.astype(compute_dtype),           # (obs+act, 256)
        "w2":    raw["w2"].astype(compute_dtype),    # (256, 128)
        "const": const.astype(jnp.float32),          # (1, 513)
    }


def _round_up(x, m):
    return ((x + m - 1) // m) * m


def _default_tile(batch):
    """One grid step per TensorCore: 1 tile on v5e/v6e, 2 tiles on v7x for
    batches big enough to split; cap a single tile at 4096 rows."""
    try:
        kind = jax.devices()[0].device_kind.lower()
    except Exception:
        kind = ""
    if "v7" in kind and batch >= 512:
        return _round_up(pl.cdiv(batch, 2), 256)     # one tile per TC
    return min(batch, 4096)


def critic_forward(state, action, params, *, tile_b=None):
    """state: [B, obs], action: [B, act] -> q: [B, 1] (float32).
    `params` must come from prepare_critic_params."""
    B = state.shape[0]
    feat = state.shape[1] + action.shape[1]

    # concat once in the wrapper -> single streamed input, single fc1 matmul
    x = jnp.concatenate([state, action], axis=1)     # (B, obs+act)

    tb = _default_tile(B) if tile_b is None else min(tile_b, B)
    if tb < B:
        tb = max(8, (tb // 8) * 8)                   # sublane-aligned when tiled
    grid = (pl.cdiv(B, tb),)

    row = lambda i: (i, 0)      # batch-tiled operands (streamed / pipelined)
    rep = lambda i: (0, 0)      # VMEM-resident weights & constants

    return pl.pallas_call(
        _critic_kernel,
        out_shape=jax.ShapeDtypeStruct((B, 1), jnp.float32),
        grid=grid,
        in_specs=[
            pl.BlockSpec((tb, feat), row),
            pl.BlockSpec(params["w1"].shape, rep),
            pl.BlockSpec(params["w2"].shape, rep),
            pl.BlockSpec(params["const"].shape, rep),
        ],
        out_specs=pl.BlockSpec((tb, 1), row),
        compiler_params=pltpu.CompilerParams(
            dimension_semantics=("parallel",)),
    )(x, params["w1"], params["w2"], params["const"])


def init_critic_params(key, obs_shape, action_shape):
    """Deterministic synthetic init (PyTorch-Linear-like uniform fan-in), f32."""
    ks = jax.random.split(key, 6)
    in1 = obs_shape + action_shape

    def u(k, shape, fan_in):
        bound = 1.0 / jnp.sqrt(fan_in)
        return jax.random.uniform(k, shape, jnp.float32, -bound, bound)

    return {
        "obs_shape": obs_shape,
        "w1": u(ks[0], (in1, H1), in1),              # (obs+act, 256), [in, out]
        "b1": u(ks[1], (1, H1), in1),
        "w2": u(ks[2], (H1, H2), H1),
        "b2": u(ks[3], (1, H2), H1),
        "w3": u(ks[4], (H2, 1), H2),
        "b3": u(ks[5], (1, 1), H2),
    }


def critic_reference(state, action, raw, max_action):
    """Pure-JAX f32 reference matching the PyTorch module."""
    a = action / max_action
    x = jnp.concatenate([state, a], axis=1)
    h1 = jax.nn.relu(x @ raw["w1"] + raw["b1"])
    h2 = jax.nn.relu(h1 @ raw["w2"] + raw["b2"])
    return h2 @ raw["w3"] + raw["b3"]


if __name__ == "__main__":
    # Shapes consistent with the module: args.obs_shape=16, args.action_shape=8
    batch, obs_shape, action_shape = 2, 16, 8
    max_action = 2.0

    key = jax.random.PRNGKey(0)
    k_state, k_action, k_params, k_big = jax.random.split(key, 4)

    state = jax.random.normal(k_state, (batch, obs_shape), jnp.float32)
    action = jax.random.normal(k_action, (batch, action_shape), jnp.float32)
    raw = init_critic_params(k_params, obs_shape, action_shape)
    q_ref = critic_reference(state, action, raw, max_action)

    # --- default bf16 MXU path (f32 accumulation), looser tolerance ---
    p_bf16 = prepare_critic_params(raw, max_action)              # bf16 default
    q_bf16 = critic_forward(state, action, p_bf16)
    jax.block_until_ready(q_bf16)
    assert q_bf16.shape == (batch, 1)
    assert jnp.allclose(q_bf16, q_ref, atol=1e-1, rtol=1e-1), (q_bf16, q_ref)

    # --- f32 path (exact module semantics), tight tolerance ---
    p_f32 = prepare_critic_params(raw, max_action, jnp.float32)
    q_f32 = critic_forward(state, action, p_f32)
    jax.block_until_ready(q_f32)
    assert jnp.allclose(q_f32, q_ref, atol=1e-5, rtol=1e-5), (q_f32, q_ref)

    # --- larger batch exercising a multi-step grid (incl. partial last tile) ---
    B2 = 300
    k_s2, k_a2 = jax.random.split(k_big)
    state2 = jax.random.normal(k_s2, (B2, obs_shape), jnp.float32)
    action2 = jax.random.normal(k_a2, (B2, action_shape), jnp.float32)
    q2_ref = critic_reference(state2, action2, raw, max_action)

    q2 = critic_forward(state2, action2, p_f32, tile_b=128)      # forced 3-step grid
    jax.block_until_ready(q2)
    assert q2.shape == (B2, 1)
    assert jnp.allclose(q2, q2_ref, atol=1e-5, rtol=1e-5)

    q2_auto = critic_forward(state2, action2, p_f32)             # default: 1 tile
    jax.block_until_ready(q2_auto)
    assert jnp.allclose(q2_auto, q2_ref, atol=1e-5, rtol=1e-5)

    # TODO(synk): for the B=2 online-inference regime, fuse twin critics /
    # target-Q evaluations into a single pallas_call to amortize launch + DMA.

    print("KERNEL_OK")
</pallas_src>

<mosaic_0001>
module attributes {stable_mosaic.version = 11 : i64} {
  func.func @_critic_kernel(%arg0: i32, %arg1: memref<2x24xf32, #tpu.memory_space<vmem>>, %arg2: memref<24x256xbf16, #tpu.memory_space<vmem>>, %arg3: memref<256x128xbf16, #tpu.memory_space<vmem>>, %arg4: memref<1x513xf32, #tpu.memory_space<vmem>>, %arg5: memref<2x1xf32, #tpu.memory_space<vmem>>) attributes {dimension_semantics = [#tpu.dimension_semantics<parallel>], iteration_bounds = array<i64: 1>, scalar_prefetch = 0 : i64, scratch_operands = 0 : i64, tpu.core_type = #tpu.core_type<tc>, window_params = [{transform_indices = @transform_0, window_bounds = array<i64: 2, 24>}, {pipeline_mode = #tpu.pipeline_mode<synchronous>, transform_indices = @transform_1, window_bounds = array<i64: 24, 256>}, {pipeline_mode = #tpu.pipeline_mode<synchronous>, transform_indices = @transform_2, window_bounds = array<i64: 256, 128>}, {pipeline_mode = #tpu.pipeline_mode<synchronous>, transform_indices = @transform_3, window_bounds = array<i64: 1, 513>}, {transform_indices = @transform_4, window_bounds = array<i64: 2, 1>}]} {
    %c0 = arith.constant 0 : index
    %c0_0 = arith.constant 0 : index
    %0 = vector.load %arg4[%c0, %c0_0] : memref<1x513xf32, #tpu.memory_space<vmem>>, vector<1x256xf32>
    %c0_1 = arith.constant 0 : index
    %c256 = arith.constant 256 : index
    %1 = vector.load %arg4[%c0_1, %c256] : memref<1x513xf32, #tpu.memory_space<vmem>>, vector<1x128xf32>
    %c0_2 = arith.constant 0 : index
    %c384 = arith.constant 384 : index
    %2 = vector.load %arg4[%c0_2, %c384] : memref<1x513xf32, #tpu.memory_space<vmem>>, vector<1x128xf32>
    %c0_3 = arith.constant 0 : index
    %c512 = arith.constant 512 : index
    %3 = vector.load %arg4[%c0_3, %c512] : memref<1x513xf32, #tpu.memory_space<vmem>>, vector<1x1xf32>
    %c0_4 = arith.constant 0 : index
    %c0_5 = arith.constant 0 : index
    %4 = vector.load %arg1[%c0_4, %c0_5] : memref<2x24xf32, #tpu.memory_space<vmem>>, vector<2x24xf32>
    %5 = arith.truncf %4 : vector<2x24xf32> to vector<2x24xbf16>
    %c0_6 = arith.constant 0 : index
    %c0_7 = arith.constant 0 : index
    %6 = vector.load %arg2[%c0_6, %c0_7] : memref<24x256xbf16, #tpu.memory_space<vmem>>, vector<24x256xbf16>
    %cst = arith.constant dense<0.000000e+00> : vector<2x256xf32>
    %7 = tpu.matmul %5, %6, %cst {dimension_numbers = #tpu.dot_dimension_numbers<[1], [0], [0], [1], [0, 0, 1, 1], [], []>} : vector<2x24xbf16>, vector<24x256xbf16>, vector<2x256xf32> -> vector<2x256xf32>
    %8 = vector.broadcast %0 : vector<1x256xf32> to vector<2x256xf32>
    %9 = arith.addf %7, %8 : vector<2x256xf32>
    %cst_8 = arith.constant 0.000000e+00 : f32
    %10 = vector.broadcast %cst_8 : f32 to vector<2x256xf32>
    %11 = arith.maximumf %9, %10 : vector<2x256xf32>
    %12 = arith.truncf %11 : vector<2x256xf32> to vector<2x256xbf16>
    %c0_9 = arith.constant 0 : index
    %c0_10 = arith.constant 0 : index
    %13 = vector.load %arg3[%c0_9, %c0_10] : memref<256x128xbf16, #tpu.memory_space<vmem>>, vector<256x128xbf16>
    %cst_11 = arith.constant dense<0.000000e+00> : vector<2x128xf32>
    %14 = tpu.matmul %12, %13, %cst_11 {dimension_numbers = #tpu.dot_dimension_numbers<[1], [0], [0], [1], [0, 0, 1, 1], [], []>} : vector<2x256xbf16>, vector<256x128xbf16>, vector<2x128xf32> -> vector<2x128xf32>
    %15 = vector.broadcast %1 : vector<1x128xf32> to vector<2x128xf32>
    %16 = arith.addf %14, %15 : vector<2x128xf32>
    %cst_12 = arith.constant 0.000000e+00 : f32
    %17 = vector.broadcast %cst_12 : f32 to vector<2x128xf32>
    %18 = arith.maximumf %16, %17 : vector<2x128xf32>
    %19 = vector.broadcast %2 : vector<1x128xf32> to vector<2x128xf32>
    %20 = arith.mulf %18, %19 : vector<2x128xf32>
    %cst_13 = arith.constant dense<0.000000e+00> : vector<2xf32>
    %21 = vector.multi_reduction <add>, %20, %cst_13 [1] : vector<2x128xf32> to vector<2xf32>
    %22 = vector.shape_cast %21 : vector<2xf32> to vector<2x1xf32>
    %23 = vector.broadcast %3 : vector<1x1xf32> to vector<2x1xf32>
    %24 = arith.addf %22, %23 : vector<2x1xf32>
    %c0_14 = arith.constant 0 : index
    %c0_15 = arith.constant 0 : index
    %25 = vector.load %arg5[%c0_14, %c0_15] : memref<2x1xf32, #tpu.memory_space<vmem>>, vector<2x1xf32>
    tpu.vector_store %arg5[%c0_14, %c0_15], %24 {strides = array<i32>} : memref<2x1xf32, #tpu.memory_space<vmem>>, vector<2x1xf32>,
    return
  }
  func.func @transform_0(%arg0: i32) -> (i32, i32) {
    %c0_i32 = arith.constant 0 : i32
    %c0_i32_0 = arith.constant 0 : i32
    return %arg0, %c0_i32 : i32, i32
  }
  func.func @transform_1(%arg0: i32) -> (i32, i32) {
    %c0_i32 = arith.constant 0 : i32
    %c0_i32_0 = arith.constant 0 : i32
    %c0_i32_1 = arith.constant 0 : i32
    return %c0_i32, %c0_i32_0 : i32, i32
  }
  func.func @transform_2(%arg0: i32) -> (i32, i32) {
    %c0_i32 = arith.constant 0 : i32
    %c0_i32_0 = arith.constant 0 : i32
    %c0_i32_1 = arith.constant 0 : i32
    return %c0_i32, %c0_i32_0 : i32, i32
  }
  func.func @transform_3(%arg0: i32) -> (i32, i32) {
    %c0_i32 = arith.constant 0 : i32
    %c0_i32_0 = arith.constant 0 : i32
    %c0_i32_1 = arith.constant 0 : i32
    return %c0_i32, %c0_i32_0 : i32, i32
  }
  func.func @transform_4(%arg0: i32) -> (i32, i32) {
    %c0_i32 = arith.constant 0 : i32
    %c0_i32_0 = arith.constant 0 : i32
    return %arg0, %c0_i32 : i32, i32
  }
}

</mosaic_0001>

<bundles_post_ra>
// kernel: tpu_custom_call.1
= control target key start
LH: loop header
LB: loop body
LE: loop exit
PB: predicated region body
PF: predicated region fallthrough
CT: control target
= control target key end

     0   :  { %9 = vsyncpa [#allocation3], 0  ;;  %s579_s0 = inlined_call_operand.hbm [shape: f32[2,24], index: 0, kind: input, shape index: {}]   ;;  %s580_s1 = inlined_call_operand.hbm [shape: bf16[24,256], index: 1, kind: input, shape index: {}]   ;;  %s581_s2 = inlined_call_operand.hbm [shape: bf16[256,128], index: 2, kind: input, shape index: {}]   ;;  %s582_s3 = inlined_call_operand.vmem [shape: f32[1,513], index: 3, kind: input, shape index: {}]   ;;  %s583_s4 = inlined_call_operand.vmem [shape: f32[2,1], index: 4, kind: output, shape index: {}]  }
   0x1   :  { %10 = vsyncpa [#allocation5], 0  ;;  %s495_s15 = smov [#allocation4]   ;;  %s425_s19 = scalar_lea.hbm %s580_s1, 384 }
   0x2   :  { %s26_s16 = sshll.u32 %s495_s15, 4  ;;  %p426_p0 = scmp.ne.s32.totalorder %s580_s1, %s425_s19  ;;  %s27_s16 = int_to_ptr.vmem [resolvable:$true] %s26_s16 }
   0x3   :  { %p429_p1 = scmp.lt.u32.totalorder %s425_s19, %s580_s1 }
   0x5   :  { %p431_p2 = pnand %p429_p1, %p426_p0 }
   0x7   :  { %434 = shalt.err (!%p431_p2)
}
   0x8   :  { %s435_s24 = scalar_lea.vmem %s27_s16, 384  ;;  %p440_p4 = scmp.lt.s32.totalorder %s27_s16, %s27_s16 }
   0x9   :  { %p436_p3 = scmp.ne.s32.totalorder %s27_s16, %s435_s24  ;;  %p441_p5 = scmp.lt.s32.totalorder %s435_s24, %s435_s24 }
   0xb   :  { %p442_p6 = por %p441_p5, %p440_p4 }
   0xd   :  { %p443_p7 = pnand %p442_p6, %p436_p3 }
   0xf   :  { %446 = shalt.err (!%p443_p7)
}
  0x10   :  { %s496_s25 = smov 128   ;;  %s497_s26 = smov 8  }
  0x11   :  { %32 = dma.hbm_to_vmem [thread:$0]  %s580_s1, 384, %s27_s16, [#allocation5], %s496_s25, %s496_s25, %s497_s26  }
  0x12   :  { %s498_s29 = smov [#allocation2]   ;;  %s499_s5 = smov [#allocation6]  }
  0x13   :  { %s17_s30 = sshll.u32 %s498_s29, 4  ;;  %s38_s6 = sshll.u32 %s499_s5, 4  ;;  %s18_s30 = int_to_ptr.vmem [resolvable:$true] %s17_s30  ;;  %s39_s6 = int_to_ptr.vmem [resolvable:$true] %s38_s6 }
  0x14   :  { %s447_s9 = scalar_lea.hbm %s579_s0, 32 }
  0x15   :  { %p448_p8 = scmp.ne.s32.totalorder %s579_s0, %s447_s9  ;;  %p451_p9 = scmp.lt.u32.totalorder %s447_s9, %s579_s0 }
  0x17   :  { %p453_p10 = pnand %p451_p9, %p448_p8 }
  0x19   :  { %456 = shalt.err (!%p453_p10)
}
  0x1a   :  { %s457_s1 = scalar_lea.vmem %s18_s30, 32  ;;  %p462_p12 = scmp.lt.s32.totalorder %s18_s30, %s18_s30 }
  0x1b   :  { %p458_p11 = scmp.ne.s32.totalorder %s18_s30, %s457_s1  ;;  %p463_p13 = scmp.lt.s32.totalorder %s457_s1, %s457_s1 }
  0x1d   :  { %p464_p0 = por %p463_p13, %p462_p12 }
  0x1f   :  { %p465_p1 = pnand %p464_p0, %p458_p11 }
  0x21   :  { %468 = shalt.err (!%p465_p1)
}
  0x22   :  { %20 = dma.hbm_to_vmem [thread:$0]  %s579_s0, 32, %s18_s30, [#allocation3]  }
  0x23   :  { %s469_s18 = scalar_lea.hbm %s581_s2, 2048 }
  0x24   :  { %p470_p2 = scmp.ne.s32.totalorder %s581_s2, %s469_s18  ;;  %p473_p3 = scmp.lt.u32.totalorder %s469_s18, %s581_s2 }
  0x26   :  { %p475_p4 = pnand %p473_p3, %p470_p2 }
  0x28   :  { %478 = shalt.err (!%p475_p4)
}
  0x29   :  { %s479_s23 = scalar_lea.vmem %s39_s6, 2048  ;;  %p484_p6 = scmp.lt.s32.totalorder %s39_s6, %s39_s6 }
  0x2a   :  { %p480_p5 = scmp.ne.s32.totalorder %s39_s6, %s479_s23  ;;  %p485_p7 = scmp.lt.s32.totalorder %s479_s23, %s479_s23 }
  0x2c   :  { %p486_p8 = por %p485_p7, %p484_p6 }
  0x2e   :  { %p487_p9 = pnand %p486_p8, %p480_p5 }
  0x30   :  { %490 = shalt.err (!%p487_p9)
}
  0x31   :  { %s500_s0 = smov 64   ;;  %s501_s24 = smov 4  }
  0x32   :  { %44 = dma.hbm_to_vmem [thread:$0]  %s581_s2, 2048, %s39_s6, [#allocation5], %s500_s0, %s500_s0, %s501_s24  }
  0x33   :  { %491 = dma.done.wait [#allocation3], 32  }
  0x34   :  { %492 = vsyncadd [#allocation3], 4294967264 }
  0x35   :  { %493 = dma.done.wait [#allocation5], 2432  }
  0x36   :  { %494 = vsyncadd [#allocation5], 4294964864  ;;  %v502_v0 = vmov 0   ;;  %v404_v1 = vld [vmem:[#allocation4 + $0x4] ss:$8 sps:$4 sm:$0xff]   ;;  %v65_v3 = vld [vmem:[#allocation4 + $0x10] sm:$0xff]  ;;  %v67_v25 = vlaneseq }
  0x37   :  { %135 = vmatprep.mubr.bf16.mxu0 %v502_v0  ;;  %v406_v2 = vld [vmem:[#allocation4] ss:$8 sps:$4 sm:$0xff]   ;;  %vm96_vm0 = vcmask 1043456   ;;  %v61_v4 = vld [vmem:[#allocation2] sm:$0x3]  ;;  %103 = vmatprep.subr.bf16.mxu0 %v404_v1  ;;  %v352_v5 = vcombine.high %v65_v3, %v65_v3  ;;  %v351_v6 = vcombine.low %v65_v3, %v65_v3  ;;  %vm92_vm1 = vcmask 195584  }
  0x38   :  { %v409_v7 = vld [vmem:[#allocation6 + $0x40] sm:$0xff]   ;;  %104 = vmatpush1.bf16.msra.mxu0 %v406_v2  ;;  %v411_v10 = vld [vmem:[#allocation6 + $0x48] sm:$0xff]   ;;  %v62_v12 = vpack.c.bf16 %v61_v4, %v61_v4  ;;  %v413_v13 = vld [vmem:[#allocation6 + $0x50] sm:$0xff]   ;;  %v68_v26 = vshrl.u32 %v67_v25, 7  ;;  %vm330_vm2 = vcmask 1041408   ;;  %vm341_vm3 = vcmask 1024  }
  0x39   :  { %v410_v8 = vld [vmem:[#allocation6] sm:$0xff]   ;;  %353 = vmatprep.subr.msk.bf16.mxu0 %vm96_vm0, %v352_v5  ;;  %v98_v9 = vsel %vm96_vm0, %v351_v6, 0  ;;  %374 = vmatprep.subr.bf16.mxu1 %v409_v7  ;;  %v412_v11 = vld [vmem:[#allocation6 + $0x8] sm:$0xff]   ;;  %v414_v14 = vld [vmem:[#allocation6 + $0x10] sm:$0xff]  }
  0x3a   :  { %375 = vmatpush3.bf16.msra.mxu1 %v410_v8  ;;  %v415_v15 = vld [vmem:[#allocation6 + $0x58] sm:$0xff]   ;;  %v417_v17 = vld [vmem:[#allocation6 + $0x60] sm:$0xff]   ;;  %v419_v19 = vld [vmem:[#allocation6 + $0x68] sm:$0xff]   ;;  %v69_v27 = vsub.s32 0, %v68_v26  ;;  %v73_v29 = vsub.s32 1, %v68_v26 }
  0x3b   :  { %376 = vmatprep.subr.bf16.mxu1 %v411_v10  ;;  %v416_v16 = vld [vmem:[#allocation6 + $0x18] sm:$0xff]   ;;  %v418_v18 = vld [vmem:[#allocation6 + $0x20] sm:$0xff]   ;;  %v420_v20 = vld [vmem:[#allocation6 + $0x28] sm:$0xff]  }
  0x3c   :  { %106 = vmatpush1.bf16.msra.mxu0 %v98_v9  ;;  %v421_v21 = vld [vmem:[#allocation6 + $0x70] sm:$0xff]   ;;  %v423_v23 = vld [vmem:[#allocation6 + $0x78] sm:$0xff]   ;;  %v355_v43 = vld [vmem:[%s582_s3 + $0x2] ss:$0 sm:$0xff] }
  0x3d   :  { %v422_v22 = vld [vmem:[#allocation6 + $0x30] sm:$0xff]   ;;  %v424_v24 = vld [vmem:[#allocation6 + $0x38] sm:$0xff]   ;;  %v372_v49 = vld [vmem:[%s582_s3 + $0x3] ss:$0 sm:$0xff] }
  0x3e   :  { %377 = vmatpush3.bf16.msra.mxu1 %v412_v11  ;;  %v57_v28 = vld [vmem:[%s582_s3] sm:$0x3]  ;;  %v373_v53 = vld [vmem:[%s582_s3 + $0x4] ss:$0 sm:$0xff] }
  0x3f   :  { %354 = vmatmul.mubr.msk.bf16.vlgmr.msra.gmra.mrb[0].mxu0 %vm92_vm1, %v62_v12  ;;  %378 = vmatprep.subr.bf16.mxu1 %v413_v13  ;;  %v70_v30 = vrot.slane %v57_v28, %v69_v27  ;;  %v74_v31 = vrot.slane %v57_v28, %v73_v29 }
  0x42   :  { %379 = vmatpush3.bf16.msra.mxu1 %v414_v14 }
  0x43   :  { %380 = vmatprep.subr.bf16.mxu1 %v415_v15 }
  0x46   :  { %381 = vmatpush3.bf16.msra.mxu1 %v416_v16 }
  0x47   :  { %382 = vmatprep.subr.bf16.mxu1 %v417_v17 }
  0x4a   :  { %383 = vmatpush3.bf16.msra.mxu1 %v418_v18 }
  0x4b   :  { %384 = vmatprep.subr.bf16.mxu1 %v419_v19 }
  0x4e   :  { %385 = vmatpush3.bf16.msra.mxu1 %v420_v20 }
  0x4f   :  { %386 = vmatprep.subr.bf16.mxu1 %v421_v21 }
  0x52   :  { %387 = vmatpush3.bf16.msra.mxu1 %v422_v22 }
  0x53   :  { %388 = vmatprep.subr.bf16.mxu1 %v423_v23 }
  0x56   :  { %389 = vmatpush3.bf16.msra.mxu1 %v424_v24 }
 0x112   :  { %v137_v32 = vpop.f32.mrb[0].mxu0 }
 0x113   :  { %v138_v33 = vadd.f32 %v137_v32, %v70_v30  ;;  %v139_v34 = vpop.f32.mrb[1].mxu0 }
 0x114   :  { %v140_v35 = vadd.f32 %v139_v34, %v74_v31  ;;  %v141_v36 = vpop.f32.mrb[2].mxu0 }
 0x115   :  { %v144_v37 = vmax.f32 %v138_v33, 0.0  ;;  %v142_v38 = vpop.f32.mrb[3].mxu0 }
 0x116   :  { %v145_v39 = vmax.f32 %v140_v35, 0.0 }
 0x117   :  { %v146_v41 = vpack.c.bf16 %v144_v37, %v144_v37 }
 0x118   :  { %v147_v40 = vpack.c.bf16 %v145_v39, %v145_v39 }
 0x11a   :  { %314 = vmatprep.mubr.bf16.mxu1 %v147_v40 }
 0x11b   :  { %315 = vmatmul.mubr.bf16.vlgmr.msra.gmra.mrb[0].mxu1 %v146_v41 }
 0x1ee   :  { %v390_v42 = vpop.f32.mrb[0].mxu1 }
 0x1ef   :  { %v391_v44 = vpop.f32.mrb[1].mxu1 }
 0x1f0   :  { %v392_v45 = vadd.f32 %v391_v44, %v390_v42  ;;  %v393_v46 = vpop.f32.mrb[2].mxu1 }
 0x1f1   :  { %v394_v47 = vpop.f32.mrb[3].mxu1 }
 0x1f2   :  { %v317_v48 = vadd.f32 %v392_v45, %v355_v43 }
 0x1f4   :  { %v322_v50 = vmax.f32 %v317_v48, 0.0 }
 0x1f6   :  { %v329_v51 = vmul.f32 %v372_v49, %v322_v50 }
 0x1f8   :  { %v331_v52 = vsel %vm330_vm2, %v329_v51, 0.0 }
 0x1f9   :  { %332 = vadd.xlane.f32.xlu0 %v331_v52 }
 0x286   :  { %v333_v54 = vpop.xlane.xlu0 %332 }
 0x287   :  { %v340_v55 = vadd.f32 %v373_v53, %v333_v54 }
 0x289   :  { %342 = vst.msk [vmem:[%s583_s4] sm:$0x3] %vm341_vm3, %v340_v55 }
 0x28a   :  { %347 = vsyncpa [#allocation3], 1 }
 0x28b   :  { %348 = vsyncpa [#allocation5], 1 }

</bundles_post_ra>
